<compile_context>
chip_gen: v7x
topology: tpu7x:2x2x1
jax: 0.10.0
libtpu: 0.0.40
codegen_flags: <defaults>
</compile_context>

<pallas_src>
import functools

import jax
import jax.numpy as jnp
from jax.experimental import pallas as pl
from jax.experimental.pallas import tpu as pltpu

_LANE = 128


def _bent_ident_par_deriv_kernel(x_ref, c1_ref, o_ref, *, four_b2):
    x = x_ref[...].astype(jnp.float32)          # (bm, bn), compute in f32
    # x / sqrt(x^2 + 4 b^2) via EUP rsqrt (separate bundle slot, ~free here).
    t = x * jax.lax.rsqrt(x * x + four_b2)
    c1 = c1_ref[...]                            # (bm, 1) f32, lane-broadcast
    o_ref[...] = (c1 * (t - 1.0) + 1.0).astype(o_ref.dtype)


def _sublane_quantum(dtype):
    # Sub-32-bit dtypes pack along sublanes: 8 rows f32, 16 bf16, 32 int8/fp8.
    return max(8, 32 // jnp.dtype(dtype).itemsize)


def _pick_col_tile(cols, itemsize, q, target_bytes):
    """Trailing block dim: full cols, or a lane-multiple tile near target."""
    if cols % _LANE != 0:
        # No 128-divisible regrouping exists; full extent (legal, masked vst).
        return cols
    if cols * itemsize * q <= target_bytes:
        return cols                              # whole rows fit the target
    max_lanes = max(_LANE, (target_bytes // (q * itemsize)) // _LANE * _LANE)
    max_lanes = min(max_lanes, cols)
    # Prefer a tile that divides cols (no masked boundary column block) if one
    # exists within 2x of the target; else accept a masked last column block.
    lo = max(_LANE, (max_lanes // 2) // _LANE * _LANE)
    for t in range(max_lanes, lo - 1, -_LANE):
        if cols % t == 0:
            return t
    return max_lanes


def _ceil_div(a, b):
    return -(-a // b)


def bent_ident_par_deriv(x_nchw, a, b=1.0, *,
                         target_block_bytes=6 << 20, min_steps=4):
    """x_nchw: (N, C, H, W); a: per-channel parameter of shape (C,) or scalar."""
    N, C, H, W = x_nchw.shape
    rows, cols = N * C, H * W
    dtype = x_nchw.dtype
    itemsize = jnp.dtype(dtype).itemsize
    q = _sublane_quantum(dtype)

    # Free view of contiguous NCHW -- no HBM copy.
    x2d = x_nchw.reshape(rows, cols)

    # Single tiny per-row (= per (n, c)) coefficient column: c1 = (1 - a)/2.
    a = jnp.asarray(a, dtype=jnp.float32)
    if a.ndim == 0:
        a = jnp.broadcast_to(a, (C,))
    c1 = jnp.tile((1.0 - a) * 0.5, N).reshape(rows, 1)

    # ---- tiling -------------------------------------------------------------
    col_tile = _pick_col_tile(cols, itemsize, q, target_block_bytes)
    bytes_per_row = col_tile * itemsize
    br = max(1, target_block_bytes // bytes_per_row)
    if br >= rows:
        block_rows = rows
    else:
        block_rows = min(rows, max(q, (br // q) * q))

    # Guarantee enough grid steps so software pipelining engages and v7x's
    # megacore has multiple blocks to shard; split rows first (keeps stores
    # wide), then columns (staying 128-aligned).
    def _steps(bm, bn):
        return _ceil_div(rows, bm) * _ceil_div(cols, bn)

    while _steps(block_rows, col_tile) < min_steps:
        if block_rows > q:
            block_rows = max(q, (block_rows // 2) // q * q)
        elif cols % _LANE == 0 and col_tile > _LANE:
            col_tile = max(_LANE, (col_tile // 2) // _LANE * _LANE)
        else:
            break   # tensor too small to split further; that's fine

    grid = (_ceil_div(rows, block_rows), _ceil_div(cols, col_tile))

    x_spec = pl.BlockSpec((block_rows, col_tile), lambda i, j: (i, j))
    c_spec = pl.BlockSpec((block_rows, 1), lambda i, j: (i, 0))

    # Explicit scoped-VMEM budget: double-buffered in + out blocks (+ margin),
    # at least the 32 MiB v6e/v7x default, capped below v7x's 64 MiB physical.
    block_bytes = block_rows * col_tile * itemsize
    vmem_limit = int(min(56 << 20, max(32 << 20, 4 * block_bytes + (4 << 20))))

    out2d = pl.pallas_call(
        functools.partial(
            _bent_ident_par_deriv_kernel, four_b2=4.0 * float(b) * float(b)),
        out_shape=jax.ShapeDtypeStruct((rows, cols), dtype),
        grid_spec=pltpu.PrefetchScalarGridSpec(
            num_scalar_prefetch=0,
            grid=grid,
            in_specs=[x_spec, c_spec],
            out_specs=x_spec,
        ),
        compiler_params=pltpu.CompilerParams(
            dimension_semantics=("parallel", "parallel"),
            vmem_limit_bytes=vmem_limit),
    )(x2d, c1)

    return out2d.reshape(N, C, H, W)


def _reference(x, a, b=1.0):
    a4 = jnp.asarray(a, jnp.float32).reshape(1, -1, 1, 1)
    xf = x.astype(jnp.float32)
    out = (1.0 - a4) / 2.0 * (xf / jnp.sqrt(xf * xf + 4.0 * b * b)) \
        + (1.0 + a4) / 2.0
    return out.astype(x.dtype)


if __name__ == "__main__":
    key = jax.random.PRNGKey(0)
    kx, ka = jax.random.split(key)

    # Primary check: small NCHW, f32, lane-aligned spatial (H*W = 256).
    N, C, H, W = 2, 4, 16, 16
    x = jax.random.normal(kx, (N, C, H, W), dtype=jnp.float32)
    a = jax.random.uniform(ka, (C,), dtype=jnp.float32)
    out = jax.block_until_ready(bent_ident_par_deriv(x, a, b=1.0))
    assert out.shape == (N, C, H, W) and out.dtype == x.dtype
    assert jnp.allclose(out, _reference(x, a, b=1.0), atol=1e-5, rtol=1e-5), \
        "f32 mismatch vs reference"

    # Non-lane-aligned spatial shape (falls back to full-row blocks).
    x2 = jax.random.normal(kx, (2, 3, 15, 10), dtype=jnp.float32)
    a2 = jax.random.uniform(ka, (3,), dtype=jnp.float32)
    out2 = jax.block_until_ready(bent_ident_par_deriv(x2, a2, b=0.5))
    assert jnp.allclose(out2, _reference(x2, a2, b=0.5), atol=1e-5, rtol=1e-5), \
        "odd-shape mismatch vs reference"

    # bf16 input: math runs in f32 in-kernel, result cast back to bf16.
    xb = x.astype(jnp.bfloat16)
    outb = jax.block_until_ready(bent_ident_par_deriv(xb, a, b=1.0))
    assert outb.dtype == jnp.bfloat16
    assert jnp.allclose(outb.astype(jnp.float32),
                        _reference(xb, a, b=1.0).astype(jnp.float32),
                        atol=2e-2, rtol=2e-2), "bf16 mismatch vs reference"

    print("KERNEL_OK")
</pallas_src>

<mosaic_0001>
module attributes {stable_mosaic.version = 11 : i64} {
  func.func @_bent_ident_par_deriv_kernel(%arg0: i32, %arg1: i32, %arg2: memref<8x128xf32, #tpu.memory_space<vmem>>, %arg3: memref<8x1xf32, #tpu.memory_space<vmem>>, %arg4: memref<8x128xf32, #tpu.memory_space<vmem>>) attributes {dimension_semantics = [#tpu.dimension_semantics<parallel>, #tpu.dimension_semantics<parallel>], iteration_bounds = array<i64: 1, 2>, scalar_prefetch = 0 : i64, scratch_operands = 0 : i64, tpu.core_type = #tpu.core_type<tc>, window_params = [{transform_indices = @transform_0, window_bounds = array<i64: 8, 128>}, {transform_indices = @transform_1, window_bounds = array<i64: 8, 1>}, {transform_indices = @transform_2, window_bounds = array<i64: 8, 128>}]} {
    %c0 = arith.constant 0 : index
    %c0_0 = arith.constant 0 : index
    %0 = vector.load %arg2[%c0, %c0_0] : memref<8x128xf32, #tpu.memory_space<vmem>>, vector<8x128xf32>
    %1 = arith.mulf %0, %0 : vector<8x128xf32>
    %cst = arith.constant 4.000000e+00 : f32
    %2 = vector.broadcast %cst : f32 to vector<8x128xf32>
    %3 = arith.addf %1, %2 : vector<8x128xf32>
    %4 = math.rsqrt %3 : vector<8x128xf32>
    %5 = arith.mulf %0, %4 : vector<8x128xf32>
    %c0_1 = arith.constant 0 : index
    %c0_2 = arith.constant 0 : index
    %6 = vector.load %arg3[%c0_1, %c0_2] : memref<8x1xf32, #tpu.memory_space<vmem>>, vector<8x1xf32>
    %cst_3 = arith.constant 1.000000e+00 : f32
    %7 = vector.broadcast %cst_3 : f32 to vector<8x128xf32>
    %8 = arith.subf %5, %7 : vector<8x128xf32>
    %9 = vector.broadcast %6 : vector<8x1xf32> to vector<8x128xf32>
    %10 = arith.mulf %9, %8 : vector<8x128xf32>
    %cst_4 = arith.constant 1.000000e+00 : f32
    %11 = vector.broadcast %cst_4 : f32 to vector<8x128xf32>
    %12 = arith.addf %10, %11 : vector<8x128xf32>
    %c0_5 = arith.constant 0 : index
    %c0_6 = arith.constant 0 : index
    %13 = vector.load %arg4[%c0_5, %c0_6] : memref<8x128xf32, #tpu.memory_space<vmem>>, vector<8x128xf32>
    tpu.vector_store %arg4[%c0_5, %c0_6], %12 {strides = array<i32>} : memref<8x128xf32, #tpu.memory_space<vmem>>, vector<8x128xf32>,
    return
  }
  func.func @transform_0(%arg0: i32, %arg1: i32) -> (i32, i32) {
    %c0_i32 = arith.constant 0 : i32
    return %arg0, %arg1 : i32, i32
  }
  func.func @transform_1(%arg0: i32, %arg1: i32) -> (i32, i32) {
    %c0_i32 = arith.constant 0 : i32
    %c0_i32_0 = arith.constant 0 : i32
    return %arg0, %c0_i32 : i32, i32
  }
  func.func @transform_2(%arg0: i32, %arg1: i32) -> (i32, i32) {
    %c0_i32 = arith.constant 0 : i32
    return %arg0, %arg1 : i32, i32
  }
}

</mosaic_0001>

<bundles_post_ra>
// kernel: tpu_custom_call.1
= control target key start
LH: loop header
LB: loop body
LE: loop exit
PB: predicated region body
PF: predicated region fallthrough
CT: control target
= control target key end

     0   :  { %7 = vsyncpa [#allocation3], 0  ;;  %s710_s0 = inlined_call_operand.hbm [shape: f32[8,256], index: 0, kind: input, shape index: {}]   ;;  %s711_s1 = inlined_call_operand.vmem [shape: f32[8,1], index: 1, kind: input, shape index: {}]   ;;  %s712_s2 = inlined_call_operand.hbm [shape: f32[8,256], index: 2, kind: output, shape index: {}]  }
   0x1   :  { %9 = vsyncpa [#allocation3 + $0x1], 0 }
   0x2   :  { %10 = vsyncpa [#allocation4], 0 }
   0x3   :  { %12 = vsyncpa [#allocation4 + $0x1], 0  ;;  %s535_s9 = smov 0   ;;  %s537_s10 = smov 0  }
   0x4   :  { %s539_s11 = smov 0   ;;  %s541_s12 = smov 0  }
   0x5   :  { %s543_s13 = smov 0   ;;  %s545_s14 = smov 0  }
   0x6 LB: > { %s322_s15 = sadd.s32 4294967295, %s515_s14   ;;  %s323_s16 = sadd.s32 4294967294, %s515_s14   ;;  %s515_s14 = sphi %s545_s14, %s18_s14   ;;  %s511_s13 = sphi %s543_s13, %s728_s13   ;;  %s507_s12 = sphi %s541_s12, %s727_s12   ;;  %s503_s11 = sphi %s539_s11, %s726_s11   ;;  %s499_s10 = sphi %s537_s10, %s725_s10   ;;  %s495_s9 = sphi %s535_s9, %s724_s9  }
   0x7   : > { %s27_s17 = sadd.s32 1, %s511_s13  ;;  %s39_s18 = sadd.s32 1, %s503_s11 }
   0x8   : > { %p28_p0 = scmp.ge.s32.totalorder %s27_s17, 2  ;;  %p46_p1 = scmp.ne.s32.totalorder %s503_s11, %s499_s10 }
   0x9   : > { %p47_p2 = scmp.eq.s32.totalorder %s515_s14, 0  ;;  %p52_p3 = scmp.ne.s32.totalorder %s499_s10, %s495_s9 }
   0xa   : > { %s730_s17 = smov (%p28_p0, %s27_s17), 0  ;;  %p53_p5 = scmp.eq.s32.totalorder %s322_s15, 0 }
   0xb   : > { %p576_p4 = por %p47_p2, %p46_p1  ;;  %s35_s20 = ssub.s32 %s511_s13, %s730_s17 }
   0xc   : > { %p104_p6 = scmp.eq.s32.totalorder %s322_s15, 1  ;;  %p37_p7 = scmp.eq.s32.totalorder %s35_s20, 0 }
   0xd   : > { %p582_p8 = por %p53_p5, %p52_p3  ;;  %p110_p10 = scmp.eq.s32.totalorder %s323_s16, 1 }
   0xe   : > { %p586_p9 = por %p104_p6, %p46_p1  ;;  %p349_p13 = scmp.lt.s32.totalorder %s515_s14, 2 }
   0xf   : > { %s591_s23 = scalar_select %p37_p7, %s503_s11, %s39_s18  }
  0x10   : > { %s716_s22 = scalar_select %p586_p9, 1, 0 }
  0x11   : > { %p593_p11 = por %p110_p10, %p52_p3  ;;  %s137_s25 = sand.u32 1, %s503_s11  }
  0x12   : > { %s327_s26 = sshll.u32 %s137_s25, 3  ;;  %s328_s27 = sshll.u32 %s511_s13, 7 }
  0x13   : > { %s717_s24 = scalar_select %p593_p11, 1, 0 }
  0x14   : > { %s604_s30 = scalar_lea.hbm %s710_s0, %s328_s27  ;;  %s141_s3 = scalar_lea.vmem [#allocation2], %s327_s26 }
  0x15   : > { %s150_s4 = sshll.u32 %s141_s3, 4  ;;  %p610_p0 = pnand %p349_p13, %p576_p4  ;;  %s606_s4 = int_to_ptr.vmem [resolvable:$true] %s150_s4 }
  0x16   : > { %s138_s6 = scalar_lea.sflag [#allocation3], %s137_s25  ;;  %s403_s7 = scalar_lea.hbm %s604_s30, 128 }
  0x17   : > { %p404_p3 = scmp.ne.s32.totalorder %s604_s30, %s403_s7  ;;  %p405_p5 = pneg %p610_p0 }
  0x18   : > { %s408_s16 = scalar_lea.hbm %s710_s0, 256  ;;  %p409_p4 = scmp.lt.u32.totalorder %s604_s30, %s710_s0 }
  0x19   : > { %p406_p6 = pnand %p405_p5, %p404_p3  ;;  %p410_p10 = scmp.lt.u32.totalorder %s408_s16, %s403_s7 }
  0x1a   : > { %p412_p12 = scmp.lt.u32.totalorder %s403_s7, %s604_s30 }
  0x1b   : > { %p407_p7 = pneg %p406_p6  ;;  %p411_p13 = por %p410_p10, %p409_p4 }
  0x1d   : > { %p413_p1 = por %p412_p12, %p411_p13 }
  0x1f   : > { %p414_p2 = pnand %p413_p1, %p407_p7 }
  0x21   : > { %417 = shalt.err (!%p414_p2)
}
  0x22   : > { %s418_s20 = scalar_lea.vmem %s606_s4, 128  ;;  %s517_s25 = smov [#allocation2]  }
  0x23   : > { %p419_p3 = scmp.ne.s32.totalorder %s606_s4, %s418_s20  ;;  %s423_s26 = sshll.u32 %s517_s25, 4  ;;  %s424_s26 = int_to_ptr.vmem [resolvable:$false] %s423_s26 }
  0x24   : > { %s425_s27 = scalar_lea.vmem %s424_s26, 256  ;;  %p426_p9 = scmp.lt.s32.totalorder %s606_s4, %s424_s26 }
  0x25   : > { %p421_p6 = pnand %p419_p3, %p405_p5  ;;  %p427_p4 = scmp.lt.s32.totalorder %s425_s27, %s418_s20 }
  0x27   : > { %p422_p11 = pneg %p421_p6  ;;  %p428_p10 = por %p427_p4, %p426_p9 }
  0x29   : > { %p429_p12 = pnand %p428_p10, %p422_p11 }
  0x2b   : > { %432 = shalt.err (!%p429_p12)
}
  0x2c   : > { %344 = dma.hbm_to_vmem [thread:$0]  (!%p610_p0), %s604_s30, 128, %s606_s4, %s138_s6  }
  0x2d   : > { %p719_p1 = scmp.lt.s32.totalorder %s515_s14, 3  ;;  %p720_p2 = scmp.ge.s32.totalorder %s515_s14, 1 }
  0x2f   : > { %p156_p5 = pnand %p720_p2, %p719_p1 }
  0x30   : > { %s646_s28 = sand.u32 (!%p156_p5), 1, %s499_s10  }
  0x31   : > { %159 = sbr.rel (%p156_p5) target bundleno = 205 (0xcd), region = 28  ;;  %s330_s29 = sshll.u32 (!%p156_p5), %s646_s28, 3 }
  0x32   : > { %s162_s3 = scalar_lea.sflag (!%p156_p5), [#allocation3], %s646_s28  ;;  %s165_s7 = scalar_lea.vmem (!%p156_p5), [#allocation2], %s330_s29 }
  0x38   : > { %486 = dma.done.wait (%p582_p8), %s162_s3, 128  }
  0x39   : > { %488 = vsyncadd (%p582_p8), %s162_s3, 4294967168  ;;  %v518_v0 = vmov 0   ;;  %v199_v1 = vld [vmem:[%s711_s1] sm:$0xff]  ;;  %s334_s21 = sshll.u32 %s507_s12, 7  ;;  %s189_s5 = scalar_lea.vmem [#allocation5], %s330_s29 }
  0x3a   : > { %400 = vset.pattern.permute.xlu0 %v518_v0  ;;  %v194_v2 = vld [vmem:[%s165_s7] sm:$0xff]  ;;  %s225_s6 = sshll.u32 %s189_s5, 4  ;;  %s661_s16 = scalar_lea.hbm %s712_s2, %s334_s21  ;;  %s663_s6 = int_to_ptr.vmem [resolvable:$true] %s225_s6 }
  0x3b   : > { %203 = vperm.xlu0 %400, %v199_v1   ;;  %v195_v3 = vmul.f32 %v194_v2, %v194_v2  ;;  %s210_s18 = scalar_lea.sflag [#allocation4], %s646_s28  ;;  %s433_s19 = scalar_lea.vmem %s663_s6, 128 }
  0x3c   : > { %p434_p8 = scmp.ne.s32.totalorder %s663_s6, %s433_s19  ;;  %p721_p9 = scmp.ne.s32.totalorder %s716_s22, 0 }
  0x3d   : > { %v196_v4 = vadd.f32 4.0, %v195_v3  ;;  %s519_s12 = smov [#allocation5]  }
  0x3e   : > { %p435_p11 = pnand %p434_p8, %p721_p9  ;;  %s437_s20 = sshll.u32 %s519_s12, 4  ;;  %s438_s20 = int_to_ptr.vmem [resolvable:$false] %s437_s20 }
  0x3f   : > { %401 = vrsqrt.f32 %v196_v4  ;;  %s439_s25 = scalar_lea.vmem %s438_s20, 256  ;;  %p440_p7 = scmp.lt.s32.totalorder %s663_s6, %s438_s20 }
  0x40   : > { %p436_p0 = pneg %p435_p11  ;;  %p441_p13 = scmp.lt.s32.totalorder %s439_s25, %s433_s19 }
  0x42   : > { %p442_p3 = por %p441_p13, %p440_p7 }
  0x44   : > { %p443_p6 = pnand %p442_p3, %p436_p0 }
  0x49   : > { %v402_v5 = vpop.eup %401 }
  0x4a   : > { %v198_v6 = vmul.f32 %v402_v5, %v194_v2 }
  0x4c   : > { %v332_v7 = vadd.f32 -1.0, %v198_v6 }
  0xba   : > { %v204_v8 = vpop.permute.xlu0 %203 }
  0xbb   : > { %v206_v9 = vmul.f32 %v332_v7, %v204_v8 }
  0xbd   : > { %v207_v10 = vadd.f32 1.0, %v206_v9 }
  0xbf   : > { %208 = vst [vmem:[%s189_s5] sm:$0xff] %v207_v10 }
  0xc0   : > { %446 = shalt.err (!%p443_p6)
}
  0xc1   : > { %s447_s26 = scalar_lea.hbm %s661_s16, 128  ;;  %s451_s29 = scalar_lea.hbm %s712_s2, 256 }
  0xc2   : > { %p448_p4 = scmp.ne.s32.totalorder %s661_s16, %s447_s26  ;;  %p452_p1 = scmp.lt.u32.totalorder %s661_s16, %s712_s2 }
  0xc3   : > { %p453_p2 = scmp.lt.u32.totalorder %s451_s29, %s447_s26  ;;  %p455_p8 = scmp.lt.u32.totalorder %s447_s26, %s661_s16 }
  0xc4   : > { %p449_p10 = pnand %p448_p4, %p721_p9 }
  0xc5   : > { %p454_p5 = por %p453_p2, %p452_p1 }
  0xc6   : > { %p450_p12 = pneg %p449_p10 }
  0xc7   : > { %p456_p11 = por %p455_p8, %p454_p5 }
  0xc9   : > { %p457_p0 = pnand %p456_p11, %p450_p12 }
  0xcb   : > { %460 = shalt.err (!%p457_p0)
}
  0xcc   : > { %339 = dma.vmem_to_hbm [thread:$0]  (%p721_p9), %s663_s6, 128, %s661_s16, %s210_s18  }
  0xcd PF: > { %s237_s30 = sand.u32 1, %s495_s9   ;;  %p722_p7 = scmp.ne.s32.totalorder %s717_s24, 0 }
  0xce   : > { %p723_p13 = scmp.ge.s32.totalorder %s515_s14, 2  ;;  %s238_s4 = scalar_lea.sflag [#allocation4], %s237_s30 }
  0xd0   : > { %p346_p3 = pnand %p723_p13, %p722_p7 }
  0xd2   : > { %490 = dma.done.wait (!%p346_p3), %s238_s4, 128  }
  0xd3   : > { %492 = vsyncadd (!%p346_p3), %s238_s4, 4294967168  ;;  %s18_s14 = sadd.s32 1, %s515_s14   ;;  %s724_s9 = smov %s499_s10 }
  0xd4   : > { %p15_p6 = scmp.ge.s32.totalorder %s18_s14, 4   ;;  %s725_s10 = smov %s503_s11 }
  0xd5   : > { %s726_s11 = smov %s591_s23  ;;  %s727_s12 = smov %s511_s13 }
  0xd6   : > { %s728_s13 = smov %s730_s17  ;;  %17 = sbr.rel (!%p15_p6) target bundleno = 6 (0x6), region = 76 }
  0xdd   :  { %243 = vsyncpa [#allocation3], 1 }
  0xde   :  { %245 = vsyncpa [#allocation3 + $0x1], 1 }
  0xdf   :  { %246 = vsyncpa [#allocation4], 1 }
  0xe0   :  { %248 = vsyncpa [#allocation4 + $0x1], 1 }

</bundles_post_ra>
